<compile_context>
chip_gen: v7x
topology: tpu7x:2x2x1
jax: 0.10.0
libtpu: 0.0.40
codegen_flags: <defaults>
</compile_context>

<pallas_src>
import functools

import jax
import jax.numpy as jnp
from jax import lax
from jax.experimental import pallas as pl
from jax.experimental.pallas import tpu as pltpu


def _resblock_kernel(x_ref, w1_ref, b1_ref, w2_ref, b2_ref,
                     sw1t_ref, sb1_ref, sw2_ref, sb2_ref, out_ref,
                     *, K, fuse_taps):
    Bt, C, L = x_ref.shape
    P = (K - 1) // 2
    cdt = w1_ref.dtype                       # matmul operand dtype (bf16 or f32)

    # (1, L) per-tap edge masks, built ONCE per grid step and shared by both
    # convs and all Bt samples (taps must not read across the sample ends).
    pos = lax.broadcasted_iota(jnp.int32, (1, L), 1)
    masks = {}
    for k in range(K):
        d = k - P
        if d != 0:
            masks[d] = (pos >= -d) if d < 0 else (pos < L - d)

    # Resident weights / biases (constant block index -> fetched once).
    w1 = w1_ref[...]
    b1 = b1_ref[...]
    w2 = w2_ref[...]
    b2 = b2_ref[...]
    sw1t = sw1t_ref[...]                     # (C, Cr)  SE squeeze weight, transposed
    sb1 = sb1_ref[...]                       # (1, Cr)
    sw2 = sw2_ref[...]                       # (C, Cr)  SE excite weight
    sb2 = sb2_ref[...]                       # (C, 1)

    def taps(x):
        # K shifted copies of x (tap with offset d reads x[:, j + d]),
        # zeroed outside the sample; shifts go through the XLU (pltpu.roll).
        out = []
        for k in range(K):
            d = k - P
            if d == 0:
                out.append(x)
            else:
                sh = pltpu.roll(x, shift=(-d) % L, axis=1)
                out.append(jnp.where(masks[d], sh, 0.0))
        return out

    def conv_bn_relu(x, w, b):
        # x: (C, L) f32.  BN scale is pre-folded into w; b is the folded bias.
        t = taps(x)
        if fuse_taps:
            # Single deep contraction: (C, K*C) x (K*C, L).
            im2col = jnp.concatenate(t, axis=0).astype(cdt)
            acc = jnp.dot(w, im2col, preferred_element_type=jnp.float32)
        else:
            # K accumulating matmuls: avoids the (K*C, L) im2col intermediate.
            acc = jnp.dot(w[0], t[0].astype(cdt),
                          preferred_element_type=jnp.float32)
            for k in range(1, K):
                acc = acc + jnp.dot(w[k], t[k].astype(cdt),
                                    preferred_element_type=jnp.float32)
        return jnp.maximum(acc + b, 0.0)

    for s in range(Bt):
        x = x_ref[s]                                           # (C, L) f32
        h1 = conv_bn_relu(x, w1, b1)
        h2 = conv_bn_relu(h1, w2, b2)
        # Squeeze-and-excite, kept off the MXU (VPU mul + XLU reductions).
        pooled = jnp.mean(h2, axis=1, keepdims=True)           # (C, 1)
        z = jnp.maximum(
            jnp.sum(sw1t * pooled, axis=0, keepdims=True) + sb1, 0.0)   # (1, Cr)
        g = jax.nn.sigmoid(
            jnp.sum(sw2 * z, axis=1, keepdims=True) + sb2)     # (C, 1)
        # SE gating + residual; (C, L) lane-dense store per sample.
        out_ref[s] = (x + h2 * g).astype(out_ref.dtype)


def _choose_batch_tile(B, C, L, K, compute_itemsize):
    """Samples per grid step: VMEM-budget aware, >=2 grid steps when B >= 2."""
    act = C * L * 4                                  # one (C, L) f32 plane
    # double-buffered in/out f32 blocks + in-kernel per-sample scratch
    # (K taps in compute dtype + x/h1/h2/acc f32 planes).
    per_sample = 4 * act + K * C * L * compute_itemsize + 4 * act
    weights = 2 * K * C * C * compute_itemsize + 16 * C * 4
    budget = 40 * 1024 * 1024                        # headroom inside v7x 64 MiB VMEM
    bt = min(B, 8, max(1, (budget - weights) // max(per_sample, 1)))
    if B >= 2:
        bt = min(bt, max(1, B // 2))                 # >=2 steps: both v7x TensorCores
    bt = max(1, int(bt))
    while B % bt:
        bt -= 1
    return int(bt)


def resblock_forward(x, params, *, compute_dtype=jnp.bfloat16, batch_tile=None):
    B, C, L = x.shape
    K = params["w1"].shape[0]
    Cr = params["se_w1"].shape[0]
    cdt = jnp.dtype(compute_dtype)

    # Fold the BN scale into the conv weights (per output channel).
    w1 = params["w1"] * params["s1"][None]           # (K, Cout, Cin)
    w2 = params["w2"] * params["s2"][None]

    # Small K*C: fuse the K taps into one deep contraction (Cout, K*Cin).
    # Large K*C: keep per-tap (K, Cout, Cin) weights; the kernel accumulates.
    fuse_taps = (K * C) <= 128
    if fuse_taps:
        w1 = jnp.transpose(w1, (1, 0, 2)).reshape(C, K * C)
        w2 = jnp.transpose(w2, (1, 0, 2)).reshape(C, K * C)
    w1 = w1.astype(cdt)
    w2 = w2.astype(cdt)

    # SE weights stay f32: they are tiny and run on VPU/XLU, not the MXU.
    sw1t = jnp.transpose(params["se_w1"])            # (C, Cr)
    sb1 = jnp.transpose(params["se_b1"])             # (1, Cr)
    sw2 = params["se_w2"]                            # (C, Cr)
    sb2 = params["se_b2"]                            # (C, 1)

    if batch_tile is None:
        batch_tile = _choose_batch_tile(B, C, L, K, cdt.itemsize)
    Bt = int(batch_tile)
    assert B % Bt == 0, (B, Bt)

    def resident(shape):
        nd = len(shape)
        return pl.BlockSpec(shape, lambda i, nd=nd: (0,) * nd)

    grid_spec = pltpu.PrefetchScalarGridSpec(
        num_scalar_prefetch=0,
        grid=(B // Bt,),
        in_specs=[
            pl.BlockSpec((Bt, C, L), lambda i: (i, 0, 0)),   # x, native (B,C,L) layout
            resident(w1.shape), resident((C, 1)),            # conv1 weight / folded bias
            resident(w2.shape), resident((C, 1)),            # conv2 weight / folded bias
            resident((C, Cr)), resident((1, Cr)),            # SE squeeze (transposed) w/b
            resident((C, Cr)), resident((C, 1)),             # SE excite w/b
        ],
        out_specs=pl.BlockSpec((Bt, C, L), lambda i: (i, 0, 0)),
    )

    return pl.pallas_call(
        functools.partial(_resblock_kernel, K=K, fuse_taps=fuse_taps),
        out_shape=jax.ShapeDtypeStruct((B, C, L), x.dtype),
        grid_spec=grid_spec,
        compiler_params=pltpu.CompilerParams(
            dimension_semantics=("parallel",),
            vmem_limit_bytes=48 * 1024 * 1024),
    )(x, w1, params["b1"], w2, params["b2"], sw1t, sb1, sw2, sb2)


def ref_forward(x, p):
    """Pure-JAX reference of the ResBlock forward (inference-mode BN)."""
    hp = jax.lax.Precision.HIGHEST

    def conv_bn_relu(h, w, s, b):
        wt = jnp.transpose(w, (1, 2, 0))             # (Cout, Cin, K)
        y = jax.lax.conv_general_dilated(
            h, wt, window_strides=(1,), padding="SAME",
            dimension_numbers=("NCH", "OIH", "NCH"), precision=hp)
        return jnp.maximum(y * s[None] + b[None], 0.0)

    h1 = conv_bn_relu(x, p["w1"], p["s1"], p["b1"])
    h2 = conv_bn_relu(h1, p["w2"], p["s2"], p["b2"])
    pooled = jnp.mean(h2, axis=2, keepdims=True)     # (B, C, 1)
    z = jnp.maximum(
        jnp.einsum("rc,bco->bro", p["se_w1"], pooled, precision=hp)
        + p["se_b1"][None], 0.0)
    g = jax.nn.sigmoid(
        jnp.einsum("cr,bro->bco", p["se_w2"], z, precision=hp)
        + p["se_b2"][None])
    return x + h2 * g


def make_params(key, C, K, se_ratio):
    Cr = C // se_ratio
    ks = jax.random.split(key, 16)

    def fold_bn(conv_b, gamma, beta, mean, var, eps=1e-5):
        scale = gamma / jnp.sqrt(var + eps)
        bias = beta + scale * (conv_b - mean)
        return scale[:, None], bias[:, None]

    w1 = 0.2 * jax.random.normal(ks[0], (K, C, C), jnp.float32)
    cb1 = 0.1 * jax.random.normal(ks[1], (C,), jnp.float32)
    s1, b1 = fold_bn(cb1,
                     1.0 + 0.1 * jax.random.normal(ks[2], (C,)),
                     0.1 * jax.random.normal(ks[3], (C,)),
                     0.05 * jax.random.normal(ks[4], (C,)),
                     1.0 + 0.1 * jnp.abs(jax.random.normal(ks[5], (C,))))

    w2 = 0.2 * jax.random.normal(ks[6], (K, C, C), jnp.float32)
    cb2 = 0.1 * jax.random.normal(ks[7], (C,), jnp.float32)
    s2, b2 = fold_bn(cb2,
                     1.0 + 0.1 * jax.random.normal(ks[8], (C,)),
                     0.1 * jax.random.normal(ks[9], (C,)),
                     0.05 * jax.random.normal(ks[10], (C,)),
                     1.0 + 0.1 * jnp.abs(jax.random.normal(ks[11], (C,))))

    se_w1 = 0.3 * jax.random.normal(ks[12], (Cr, C), jnp.float32)
    se_b1 = 0.1 * jax.random.normal(ks[13], (Cr, 1), jnp.float32)
    se_w2 = 0.3 * jax.random.normal(ks[14], (C, Cr), jnp.float32)
    se_b2 = 0.1 * jax.random.normal(ks[15], (C, 1), jnp.float32)

    return dict(w1=w1, s1=s1, b1=b1, w2=w2, s2=s2, b2=b2,
                se_w1=se_w1, se_b1=se_b1, se_w2=se_w2, se_b2=se_b2)


if __name__ == "__main__":
    B, C, L, K, SE_RATIO = 4, 8, 128, 3, 4   # n_channels=8, kernel_size=3, se_ratio=4
    key = jax.random.PRNGKey(0)
    kx, kp = jax.random.split(key)
    x = jax.random.normal(kx, (B, C, L), jnp.float32)
    params = make_params(kp, C, K, SE_RATIO)

    ref = ref_forward(x, params)

    # Exact-f32 MXU-operand path: tight numerical check.
    out_f32 = jax.block_until_ready(
        resblock_forward(x, params, compute_dtype=jnp.float32))
    assert out_f32.shape == (B, C, L)
    err_f32 = float(jnp.max(jnp.abs(out_f32 - ref)))
    assert jnp.allclose(out_f32, ref, atol=5e-4, rtol=5e-4), err_f32

    # Default path: bf16 MXU operands with f32 accumulation (looser tolerance).
    out_bf16 = jax.block_until_ready(resblock_forward(x, params))
    err_bf16 = float(jnp.max(jnp.abs(out_bf16 - ref)))
    assert jnp.allclose(out_bf16, ref, atol=8e-2, rtol=8e-2), err_bf16

    print("KERNEL_OK")
</pallas_src>

<mosaic_0001>
module attributes {stable_mosaic.version = 11 : i64} {
  func.func @_resblock_kernel(%arg0: i32, %arg1: memref<2x8x128xf32, #tpu.memory_space<vmem>>, %arg2: memref<8x24xf32, #tpu.memory_space<vmem>>, %arg3: memref<8x1xf32, #tpu.memory_space<vmem>>, %arg4: memref<8x24xf32, #tpu.memory_space<vmem>>, %arg5: memref<8x1xf32, #tpu.memory_space<vmem>>, %arg6: memref<8x2xf32, #tpu.memory_space<vmem>>, %arg7: memref<1x2xf32, #tpu.memory_space<vmem>>, %arg8: memref<8x2xf32, #tpu.memory_space<vmem>>, %arg9: memref<8x1xf32, #tpu.memory_space<vmem>>, %arg10: memref<2x8x128xf32, #tpu.memory_space<vmem>>) attributes {dimension_semantics = [#tpu.dimension_semantics<parallel>], iteration_bounds = array<i64: 2>, scalar_prefetch = 0 : i64, scratch_operands = 0 : i64, tpu.core_type = #tpu.core_type<tc>, window_params = [{transform_indices = @transform_0, window_bounds = array<i64: 2, 8, 128>}, {pipeline_mode = #tpu.pipeline_mode<synchronous>, transform_indices = @transform_1, window_bounds = array<i64: 8, 24>}, {pipeline_mode = #tpu.pipeline_mode<synchronous>, transform_indices = @transform_2, window_bounds = array<i64: 8, 1>}, {pipeline_mode = #tpu.pipeline_mode<synchronous>, transform_indices = @transform_3, window_bounds = array<i64: 8, 24>}, {pipeline_mode = #tpu.pipeline_mode<synchronous>, transform_indices = @transform_4, window_bounds = array<i64: 8, 1>}, {pipeline_mode = #tpu.pipeline_mode<synchronous>, transform_indices = @transform_5, window_bounds = array<i64: 8, 2>}, {pipeline_mode = #tpu.pipeline_mode<synchronous>, transform_indices = @transform_6, window_bounds = array<i64: 1, 2>}, {pipeline_mode = #tpu.pipeline_mode<synchronous>, transform_indices = @transform_7, window_bounds = array<i64: 8, 2>}, {pipeline_mode = #tpu.pipeline_mode<synchronous>, transform_indices = @transform_8, window_bounds = array<i64: 8, 1>}, {transform_indices = @transform_9, window_bounds = array<i64: 2, 8, 128>}]} {
    %0 = tpu.iota {dimensions = array<i32: 1>} : vector<1x128xi32>
    %c1_i32 = arith.constant 1 : i32
    %1 = vector.broadcast %c1_i32 : i32 to vector<1x128xi32>
    %2 = arith.cmpi sge, %0, %1 : vector<1x128xi32>
    %c127_i32 = arith.constant 127 : i32
    %3 = vector.broadcast %c127_i32 : i32 to vector<1x128xi32>
    %4 = arith.cmpi slt, %0, %3 : vector<1x128xi32>
    %c0 = arith.constant 0 : index
    %c0_0 = arith.constant 0 : index
    %5 = vector.load %arg2[%c0, %c0_0] : memref<8x24xf32, #tpu.memory_space<vmem>>, vector<8x24xf32>
    %c0_1 = arith.constant 0 : index
    %c0_2 = arith.constant 0 : index
    %6 = vector.load %arg3[%c0_1, %c0_2] : memref<8x1xf32, #tpu.memory_space<vmem>>, vector<8x1xf32>
    %c0_3 = arith.constant 0 : index
    %c0_4 = arith.constant 0 : index
    %7 = vector.load %arg4[%c0_3, %c0_4] : memref<8x24xf32, #tpu.memory_space<vmem>>, vector<8x24xf32>
    %c0_5 = arith.constant 0 : index
    %c0_6 = arith.constant 0 : index
    %8 = vector.load %arg5[%c0_5, %c0_6] : memref<8x1xf32, #tpu.memory_space<vmem>>, vector<8x1xf32>
    %c0_7 = arith.constant 0 : index
    %c0_8 = arith.constant 0 : index
    %9 = vector.load %arg6[%c0_7, %c0_8] : memref<8x2xf32, #tpu.memory_space<vmem>>, vector<8x2xf32>
    %c0_9 = arith.constant 0 : index
    %c0_10 = arith.constant 0 : index
    %10 = vector.load %arg7[%c0_9, %c0_10] : memref<1x2xf32, #tpu.memory_space<vmem>>, vector<1x2xf32>
    %c0_11 = arith.constant 0 : index
    %c0_12 = arith.constant 0 : index
    %11 = vector.load %arg8[%c0_11, %c0_12] : memref<8x2xf32, #tpu.memory_space<vmem>>, vector<8x2xf32>
    %c0_13 = arith.constant 0 : index
    %c0_14 = arith.constant 0 : index
    %12 = vector.load %arg9[%c0_13, %c0_14] : memref<8x1xf32, #tpu.memory_space<vmem>>, vector<8x1xf32>
    %c0_15 = arith.constant 0 : index
    %c0_16 = arith.constant 0 : index
    %c0_17 = arith.constant 0 : index
    %13 = vector.load %arg1[%c0_15, %c0_16, %c0_17] : memref<2x8x128xf32, #tpu.memory_space<vmem>>, vector<1x8x128xf32>
    %14 = vector.shape_cast %13 : vector<1x8x128xf32> to vector<8x128xf32>
    %c1_i32_18 = arith.constant 1 : i32
    %15 = tpu.dynamic_rotate %14 by %c1_i32_18 dim 1 : vector<8x128xf32>, i32 -> vector<8x128xf32>
    %cst = arith.constant 0.000000e+00 : f32
    %16 = vector.shape_cast %2 : vector<1x128xi1> to vector<1x128xi1>
    %17 = vector.broadcast %16 : vector<1x128xi1> to vector<8x128xi1>
    %18 = vector.broadcast %cst : f32 to vector<8x128xf32>
    %19 = arith.select %17, %15, %18 : vector<8x128xi1>, vector<8x128xf32>
    %c127_i32_19 = arith.constant 127 : i32
    %20 = tpu.dynamic_rotate %14 by %c127_i32_19 dim 1 : vector<8x128xf32>, i32 -> vector<8x128xf32>
    %cst_20 = arith.constant 0.000000e+00 : f32
    %21 = vector.shape_cast %4 : vector<1x128xi1> to vector<1x128xi1>
    %22 = vector.broadcast %21 : vector<1x128xi1> to vector<8x128xi1>
    %23 = vector.broadcast %cst_20 : f32 to vector<8x128xf32>
    %24 = arith.select %22, %20, %23 : vector<8x128xi1>, vector<8x128xf32>
    %25 = tpu.concatenate %19, %14, %24 in 0 : vector<8x128xf32>, vector<8x128xf32>, vector<8x128xf32> -> vector<24x128xf32>
    %cst_21 = arith.constant dense<0.000000e+00> : vector<8x128xf32>
    %26 = tpu.matmul %5, %25, %cst_21 {dimension_numbers = #tpu.dot_dimension_numbers<[1], [0], [0], [1], [0, 0, 1, 1], [], []>} : vector<8x24xf32>, vector<24x128xf32>, vector<8x128xf32> -> vector<8x128xf32>
    %27 = vector.broadcast %6 : vector<8x1xf32> to vector<8x128xf32>
    %28 = arith.addf %26, %27 : vector<8x128xf32>
    %cst_22 = arith.constant 0.000000e+00 : f32
    %29 = vector.broadcast %cst_22 : f32 to vector<8x128xf32>
    %30 = arith.maximumf %28, %29 : vector<8x128xf32>
    %c1_i32_23 = arith.constant 1 : i32
    %31 = tpu.dynamic_rotate %30 by %c1_i32_23 dim 1 : vector<8x128xf32>, i32 -> vector<8x128xf32>
    %cst_24 = arith.constant 0.000000e+00 : f32
    %32 = vector.shape_cast %2 : vector<1x128xi1> to vector<1x128xi1>
    %33 = vector.broadcast %32 : vector<1x128xi1> to vector<8x128xi1>
    %34 = vector.broadcast %cst_24 : f32 to vector<8x128xf32>
    %35 = arith.select %33, %31, %34 : vector<8x128xi1>, vector<8x128xf32>
    %c127_i32_25 = arith.constant 127 : i32
    %36 = tpu.dynamic_rotate %30 by %c127_i32_25 dim 1 : vector<8x128xf32>, i32 -> vector<8x128xf32>
    %cst_26 = arith.constant 0.000000e+00 : f32
    %37 = vector.shape_cast %4 : vector<1x128xi1> to vector<1x128xi1>
    %38 = vector.broadcast %37 : vector<1x128xi1> to vector<8x128xi1>
    %39 = vector.broadcast %cst_26 : f32 to vector<8x128xf32>
    %40 = arith.select %38, %36, %39 : vector<8x128xi1>, vector<8x128xf32>
    %41 = tpu.concatenate %35, %30, %40 in 0 : vector<8x128xf32>, vector<8x128xf32>, vector<8x128xf32> -> vector<24x128xf32>
    %cst_27 = arith.constant dense<0.000000e+00> : vector<8x128xf32>
    %42 = tpu.matmul %7, %41, %cst_27 {dimension_numbers = #tpu.dot_dimension_numbers<[1], [0], [0], [1], [0, 0, 1, 1], [], []>} : vector<8x24xf32>, vector<24x128xf32>, vector<8x128xf32> -> vector<8x128xf32>
    %43 = vector.broadcast %8 : vector<8x1xf32> to vector<8x128xf32>
    %44 = arith.addf %42, %43 : vector<8x128xf32>
    %cst_28 = arith.constant 0.000000e+00 : f32
    %45 = vector.broadcast %cst_28 : f32 to vector<8x128xf32>
    %46 = arith.maximumf %44, %45 : vector<8x128xf32>
    %cst_29 = arith.constant dense<0.000000e+00> : vector<8xf32>
    %47 = vector.multi_reduction <add>, %46, %cst_29 [1] : vector<8x128xf32> to vector<8xf32>
    %48 = vector.shape_cast %47 : vector<8xf32> to vector<8x1xf32>
    %cst_30 = arith.constant 1.280000e+02 : f32
    %49 = vector.broadcast %cst_30 : f32 to vector<8x1xf32>
    %50 = arith.divf %48, %49 : vector<8x1xf32>
    %51 = vector.broadcast %50 : vector<8x1xf32> to vector<8x2xf32>
    %52 = arith.mulf %9, %51 : vector<8x2xf32>
    %cst_31 = arith.constant dense<0.000000e+00> : vector<2xf32>
    %53 = vector.multi_reduction <add>, %52, %cst_31 [0] : vector<8x2xf32> to vector<2xf32>
    %54 = vector.shape_cast %53 : vector<2xf32> to vector<1x2xf32>
    %55 = arith.addf %54, %10 : vector<1x2xf32>
    %cst_32 = arith.constant 0.000000e+00 : f32
    %56 = vector.broadcast %cst_32 : f32 to vector<1x2xf32>
    %57 = arith.maximumf %55, %56 : vector<1x2xf32>
    %58 = vector.broadcast %57 : vector<1x2xf32> to vector<8x2xf32>
    %59 = arith.mulf %11, %58 : vector<8x2xf32>
    %cst_33 = arith.constant dense<0.000000e+00> : vector<8xf32>
    %60 = vector.multi_reduction <add>, %59, %cst_33 [1] : vector<8x2xf32> to vector<8xf32>
    %61 = vector.shape_cast %60 : vector<8xf32> to vector<8x1xf32>
    %62 = arith.addf %61, %12 : vector<8x1xf32>
    %63 = arith.negf %62 : vector<8x1xf32>
    %64 = math.exp %63 : vector<8x1xf32>
    %cst_34 = arith.constant 1.000000e+00 : f32
    %65 = vector.broadcast %cst_34 : f32 to vector<8x1xf32>
    %66 = arith.addf %65, %64 : vector<8x1xf32>
    %67 = arith.divf %65, %66 : vector<8x1xf32>
    %68 = vector.broadcast %67 : vector<8x1xf32> to vector<8x128xf32>
    %69 = arith.mulf %46, %68 : vector<8x128xf32>
    %70 = arith.addf %14, %69 : vector<8x128xf32>
    %c0_35 = arith.constant 0 : index
    %c0_36 = arith.constant 0 : index
    %c0_37 = arith.constant 0 : index
    %71 = vector.load %arg10[%c0_35, %c0_36, %c0_37] : memref<2x8x128xf32, #tpu.memory_space<vmem>>, vector<1x8x128xf32>
    %72 = vector.shape_cast %71 : vector<1x8x128xf32> to vector<8x128xf32>
    %73 = vector.shape_cast %70 : vector<8x128xf32> to vector<1x8x128xf32>
    tpu.vector_store %arg10[%c0_35, %c0_36, %c0_37], %73 {strides = array<i32>} : memref<2x8x128xf32, #tpu.memory_space<vmem>>, vector<1x8x128xf32>,
    %c1 = arith.constant 1 : index
    %c0_38 = arith.constant 0 : index
    %c0_39 = arith.constant 0 : index
    %74 = vector.load %arg1[%c1, %c0_38, %c0_39] : memref<2x8x128xf32, #tpu.memory_space<vmem>>, vector<1x8x128xf32>
    %75 = vector.shape_cast %74 : vector<1x8x128xf32> to vector<8x128xf32>
    %c1_i32_40 = arith.constant 1 : i32
    %76 = tpu.dynamic_rotate %75 by %c1_i32_40 dim 1 : vector<8x128xf32>, i32 -> vector<8x128xf32>
    %cst_41 = arith.constant 0.000000e+00 : f32
    %77 = vector.shape_cast %2 : vector<1x128xi1> to vector<1x128xi1>
    %78 = vector.broadcast %77 : vector<1x128xi1> to vector<8x128xi1>
    %79 = vector.broadcast %cst_41 : f32 to vector<8x128xf32>
    %80 = arith.select %78, %76, %79 : vector<8x128xi1>, vector<8x128xf32>
    %c127_i32_42 = arith.constant 127 : i32
    %81 = tpu.dynamic_rotate %75 by %c127_i32_42 dim 1 : vector<8x128xf32>, i32 -> vector<8x128xf32>
    %cst_43 = arith.constant 0.000000e+00 : f32
    %82 = vector.shape_cast %4 : vector<1x128xi1> to vector<1x128xi1>
    %83 = vector.broadcast %82 : vector<1x128xi1> to vector<8x128xi1>
    %84 = vector.broadcast %cst_43 : f32 to vector<8x128xf32>
    %85 = arith.select %83, %81, %84 : vector<8x128xi1>, vector<8x128xf32>
    %86 = tpu.concatenate %80, %75, %85 in 0 : vector<8x128xf32>, vector<8x128xf32>, vector<8x128xf32> -> vector<24x128xf32>
    %cst_44 = arith.constant dense<0.000000e+00> : vector<8x128xf32>
    %87 = tpu.matmul %5, %86, %cst_44 {dimension_numbers = #tpu.dot_dimension_numbers<[1], [0], [0], [1], [0, 0, 1, 1], [], []>} : vector<8x24xf32>, vector<24x128xf32>, vector<8x128xf32> -> vector<8x128xf32>
    %88 = vector.broadcast %6 : vector<8x1xf32> to vector<8x128xf32>
    %89 = arith.addf %87, %88 : vector<8x128xf32>
    %cst_45 = arith.constant 0.000000e+00 : f32
    %90 = vector.broadcast %cst_45 : f32 to vector<8x128xf32>
    %91 = arith.maximumf %89, %90 : vector<8x128xf32>
    %c1_i32_46 = arith.constant 1 : i32
    %92 = tpu.dynamic_rotate %91 by %c1_i32_46 dim 1 : vector<8x128xf32>, i32 -> vector<8x128xf32>
    %cst_47 = arith.constant 0.000000e+00 : f32
    %93 = vector.shape_cast %2 : vector<1x128xi1> to vector<1x128xi1>
    %94 = vector.broadcast %93 : vector<1x128xi1> to vector<8x128xi1>
    %95 = vector.broadcast %cst_47 : f32 to vector<8x128xf32>
    %96 = arith.select %94, %92, %95 : vector<8x128xi1>, vector<8x128xf32>
    %c127_i32_48 = arith.constant 127 : i32
    %97 = tpu.dynamic_rotate %91 by %c127_i32_48 dim 1 : vector<8x128xf32>, i32 -> vector<8x128xf32>
    %cst_49 = arith.constant 0.000000e+00 : f32
    %98 = vector.shape_cast %4 : vector<1x128xi1> to vector<1x128xi1>
    %99 = vector.broadcast %98 : vector<1x128xi1> to vector<8x128xi1>
    %100 = vector.broadcast %cst_49 : f32 to vector<8x128xf32>
    %101 = arith.select %99, %97, %100 : vector<8x128xi1>, vector<8x128xf32>
    %102 = tpu.concatenate %96, %91, %101 in 0 : vector<8x128xf32>, vector<8x128xf32>, vector<8x128xf32> -> vector<24x128xf32>
    %cst_50 = arith.constant dense<0.000000e+00> : vector<8x128xf32>
    %103 = tpu.matmul %7, %102, %cst_50 {dimension_numbers = #tpu.dot_dimension_numbers<[1], [0], [0], [1], [0, 0, 1, 1], [], []>} : vector<8x24xf32>, vector<24x128xf32>, vector<8x128xf32> -> vector<8x128xf32>
    %104 = vector.broadcast %8 : vector<8x1xf32> to vector<8x128xf32>
    %105 = arith.addf %103, %104 : vector<8x128xf32>
    %cst_51 = arith.constant 0.000000e+00 : f32
    %106 = vector.broadcast %cst_51 : f32 to vector<8x128xf32>
    %107 = arith.maximumf %105, %106 : vector<8x128xf32>
    %cst_52 = arith.constant dense<0.000000e+00> : vector<8xf32>
    %108 = vector.multi_reduction <add>, %107, %cst_52 [1] : vector<8x128xf32> to vector<8xf32>
    %109 = vector.shape_cast %108 : vector<8xf32> to vector<8x1xf32>
    %cst_53 = arith.constant 1.280000e+02 : f32
    %110 = vector.broadcast %cst_53 : f32 to vector<8x1xf32>
    %111 = arith.divf %109, %110 : vector<8x1xf32>
    %112 = vector.broadcast %111 : vector<8x1xf32> to vector<8x2xf32>
    %113 = arith.mulf %9, %112 : vector<8x2xf32>
    %cst_54 = arith.constant dense<0.000000e+00> : vector<2xf32>
    %114 = vector.multi_reduction <add>, %113, %cst_54 [0] : vector<8x2xf32> to vector<2xf32>
    %115 = vector.shape_cast %114 : vector<2xf32> to vector<1x2xf32>
    %116 = arith.addf %115, %10 : vector<1x2xf32>
    %cst_55 = arith.constant 0.000000e+00 : f32
    %117 = vector.broadcast %cst_55 : f32 to vector<1x2xf32>
    %118 = arith.maximumf %116, %117 : vector<1x2xf32>
    %119 = vector.broadcast %118 : vector<1x2xf32> to vector<8x2xf32>
    %120 = arith.mulf %11, %119 : vector<8x2xf32>
    %cst_56 = arith.constant dense<0.000000e+00> : vector<8xf32>
    %121 = vector.multi_reduction <add>, %120, %cst_56 [1] : vector<8x2xf32> to vector<8xf32>
    %122 = vector.shape_cast %121 : vector<8xf32> to vector<8x1xf32>
    %123 = arith.addf %122, %12 : vector<8x1xf32>
    %124 = arith.negf %123 : vector<8x1xf32>
    %125 = math.exp %124 : vector<8x1xf32>
    %cst_57 = arith.constant 1.000000e+00 : f32
    %126 = vector.broadcast %cst_57 : f32 to vector<8x1xf32>
    %127 = arith.addf %126, %125 : vector<8x1xf32>
    %128 = arith.divf %126, %127 : vector<8x1xf32>
    %129 = vector.broadcast %128 : vector<8x1xf32> to vector<8x128xf32>
    %130 = arith.mulf %107, %129 : vector<8x128xf32>
    %131 = arith.addf %75, %130 : vector<8x128xf32>
    %c1_58 = arith.constant 1 : index
    %c0_59 = arith.constant 0 : index
    %c0_60 = arith.constant 0 : index
    %132 = vector.load %arg10[%c1_58, %c0_59, %c0_60] : memref<2x8x128xf32, #tpu.memory_space<vmem>>, vector<1x8x128xf32>
    %133 = vector.shape_cast %132 : vector<1x8x128xf32> to vector<8x128xf32>
    %134 = vector.shape_cast %131 : vector<8x128xf32> to vector<1x8x128xf32>
    tpu.vector_store %arg10[%c1_58, %c0_59, %c0_60], %134 {strides = array<i32>} : memref<2x8x128xf32, #tpu.memory_space<vmem>>, vector<1x8x128xf32>,
    return
  }
  func.func @transform_0(%arg0: i32) -> (i32, i32, i32) {
    %c0_i32 = arith.constant 0 : i32
    %c0_i32_0 = arith.constant 0 : i32
    %c0_i32_1 = arith.constant 0 : i32
    return %arg0, %c0_i32, %c0_i32_0 : i32, i32, i32
  }
  func.func @transform_1(%arg0: i32) -> (i32, i32) {
    %c0_i32 = arith.constant 0 : i32
    %c0_i32_0 = arith.constant 0 : i32
    %c0_i32_1 = arith.constant 0 : i32
    return %c0_i32, %c0_i32_0 : i32, i32
  }
  func.func @transform_2(%arg0: i32) -> (i32, i32) {
    %c0_i32 = arith.constant 0 : i32
    %c0_i32_0 = arith.constant 0 : i32
    %c0_i32_1 = arith.constant 0 : i32
    return %c0_i32, %c0_i32_0 : i32, i32
  }
  func.func @transform_3(%arg0: i32) -> (i32, i32) {
    %c0_i32 = arith.constant 0 : i32
    %c0_i32_0 = arith.constant 0 : i32
    %c0_i32_1 = arith.constant 0 : i32
    return %c0_i32, %c0_i32_0 : i32, i32
  }
  func.func @transform_4(%arg0: i32) -> (i32, i32) {
    %c0_i32 = arith.constant 0 : i32
    %c0_i32_0 = arith.constant 0 : i32
    %c0_i32_1 = arith.constant 0 : i32
    return %c0_i32, %c0_i32_0 : i32, i32
  }
  func.func @transform_5(%arg0: i32) -> (i32, i32) {
    %c0_i32 = arith.constant 0 : i32
    %c0_i32_0 = arith.constant 0 : i32
    %c0_i32_1 = arith.constant 0 : i32
    return %c0_i32, %c0_i32_0 : i32, i32
  }
  func.func @transform_6(%arg0: i32) -> (i32, i32) {
    %c0_i32 = arith.constant 0 : i32
    %c0_i32_0 = arith.constant 0 : i32
    %c0_i32_1 = arith.constant 0 : i32
    return %c0_i32, %c0_i32_0 : i32, i32
  }
  func.func @transform_7(%arg0: i32) -> (i32, i32) {
    %c0_i32 = arith.constant 0 : i32
    %c0_i32_0 = arith.constant 0 : i32
    %c0_i32_1 = arith.constant 0 : i32
    return %c0_i32, %c0_i32_0 : i32, i32
  }
  func.func @transform_8(%arg0: i32) -> (i32, i32) {
    %c0_i32 = arith.constant 0 : i32
    %c0_i32_0 = arith.constant 0 : i32
    %c0_i32_1 = arith.constant 0 : i32
    return %c0_i32, %c0_i32_0 : i32, i32
  }
  func.func @transform_9(%arg0: i32) -> (i32, i32, i32) {
    %c0_i32 = arith.constant 0 : i32
    %c0_i32_0 = arith.constant 0 : i32
    %c0_i32_1 = arith.constant 0 : i32
    return %arg0, %c0_i32, %c0_i32_0 : i32, i32, i32
  }
}

</mosaic_0001>

<bundles_post_ra>
// kernel: tpu_custom_call.1
= control target key start
LH: loop header
LB: loop body
LE: loop exit
PB: predicated region body
PF: predicated region fallthrough
CT: control target
= control target key end

     0   :  { %14 = vsyncpa [#allocation3], 0  ;;  %s1310_s0 = inlined_call_operand.vmem [shape: f32[4,8,128], index: 0, kind: input, shape index: {}]   ;;  %s1311_s1 = inlined_call_operand.vmem [shape: f32[8,24], index: 1, kind: input, shape index: {}]   ;;  %s1312_s2 = inlined_call_operand.vmem [shape: f32[8,1], index: 2, kind: input, shape index: {}]   ;;  %s1313_s3 = inlined_call_operand.vmem [shape: f32[8,24], index: 3, kind: input, shape index: {}]   ;;  %s1314_s4 = inlined_call_operand.vmem [shape: f32[8,1], index: 4, kind: input, shape index: {}]   ;;  %s1315_s5 = inlined_call_operand.vmem [shape: f32[8,2], index: 5, kind: input, shape index: {}]   ;;  %s1316_s6 = inlined_call_operand.vmem [shape: f32[1,2], index: 6, kind: input, shape index: {}]   ;;  %s1317_s7 = inlined_call_operand.vmem [shape: f32[8,2], index: 7, kind: input, shape index: {}]   ;;  %s1318_s8 = inlined_call_operand.vmem [shape: f32[8,1], index: 8, kind: input, shape index: {}]   ;;  %s1319_s9 = inlined_call_operand.hbm [shape: f32[4,8,128], index: 9, kind: output, shape index: {}]  }
   0x1   :  { %16 = vsyncpa [#allocation3 + $0x1], 0  ;;  %s1108_s30 = smov 0   ;;  %s1110_s10 = smov 0  }
   0x2   :  { %s1112_s11 = smov 0   ;;  %s1114_s12 = smov 0  }
   0x3 LB: > { %s1129_s13 = sadd.s32 4294967295, %s1046_s12   ;;  %s829_s14 = sadd.s32 4294967294, %s1046_s12   ;;  %s1046_s12 = sphi %s1114_s12, %s1327_s12   ;;  %s1042_s11 = sphi %s1112_s11, %s1326_s11   ;;  %s1038_s10 = sphi %s1110_s10, %s1325_s10   ;;  %s1034_s30 = sphi %s1108_s30, %s1324_s30  }
   0x4   : > { %s1133_s15 = sadd.s32 1, %s1046_s12   ;;  %s223_s16 = sadd.s32 1, %s1042_s11 }
   0x5   : > { %s220_s17 = ssub.s32 %s1046_s12, %s1133_s15  ;;  %p233_p0 = scmp.ne.s32.totalorder %s1042_s11, %s1038_s10 }
   0x6   : > { %p221_p1 = scmp.eq.s32.totalorder %s220_s17, 0  ;;  %p234_p2 = scmp.eq.s32.totalorder %s1129_s13, 1 }
   0x7   : > { %p239_p3 = scmp.ne.s32.totalorder %s1038_s10, %s1034_s30  ;;  %p240_p4 = scmp.eq.s32.totalorder %s829_s14, 1 }
   0x8   : > { %s1144_s18 = scalar_select %p221_p1, %s1042_s11, %s223_s16  }
   0x9   : > { %p1146_p5 = por %p234_p2, %p233_p0  ;;  %p1150_p6 = por %p240_p4, %p239_p3 }
   0xa   : > { %p832_p7 = scmp.ge.s32.totalorder %s1046_s12, 1  ;;  %p291_p8 = scmp.lt.s32.totalorder %s1046_s12, 3 }
   0xc   : > { %p292_p9 = pnand %p832_p7, %p291_p8 }
   0xd   : > { %s834_s21 = sshll.u32 (!%p292_p9), %s1129_s13, 1  ;;  %v1048_v0 = vmov (!%p292_p9), 0.0|0.0   ;;  %vm1049_vm0 = vmmov (!%p292_p9), 0   ;;  %v1050_v1 = vmov (!%p292_p9), 0.0   ;;  %s1051_s26 = smov (!%p292_p9), 1   ;;  %v1052_v4 = vmov (!%p292_p9), 0  }
   0xe   : > { %295 = sbr.rel (%p292_p9) target bundleno = 1192 (0x4a8), region = 56  ;;  %p328_p10 = scmp.lt.s32.totalorder (!%p292_p9), %s834_s21, 3  ;;  %910 = vmatprep.subr.bf16.mxu0 (!%p292_p9), %v1048_v0  ;;  %914 = vmatprep.subr.bf16.mxu1 (!%p292_p9), %v1048_v0  ;;  %v339_v5 = vld [vmem:[%s1312_s2] sm:$0xff] (!%p292_p9)  ;;  %v334_v6 = vlaneseq (!%p292_p9)  ;;  %vm1054_vm2 = vmmov (!%p292_p9), 1   ;;  %vm362_vm5 = vcmask (!%p292_p9), 195584   ;;  %vm527_vm6 = vcmask (!%p292_p9), 15360  }
   0xf   : > { %880 = vmatprep.mubr.msk.f32.mxu0 (!%p292_p9), %vm1049_vm0, %v1050_v1  ;;  %889 = vmatprep.mubr.msk.f32.mxu1 (!%p292_p9), %vm1049_vm0, %v1050_v1  ;;  %s1053_s27 = smov (!%p292_p9), 127   ;;  %v338_v14 = vld [vmem:[%s1311_s1] sm:$0xff] (!%p292_p9)  ;;  %s324_s17 = sand.u32 (!%p292_p9), 1, %s1038_s10  }
  0x10   : > { %974 = vset.pattern.permute.xlu0 (!%p292_p9), %v1052_v4  ;;  %975 = vset.pattern.permute.xlu1 (!%p292_p9), %v1052_v4  ;;  %v335_v7 = vand.u32 (!%p292_p9), 127, %v334_v6  ;;  %v341_v25 = vld [vmem:[%s1314_s4] sm:$0xff] (!%p292_p9)  ;;  %v538_v58 = vshrl.u32 (!%p292_p9), %v334_v6, 7  ;;  %s857_s24 = sshll.u32 (!%p292_p9), %s1129_s13, 8  ;;  %s1269_s28 = scalar_lea.sflag (!%p292_p9), [#allocation3], %s324_s17 }
  0x11   : > { %v340_v28 = vld [vmem:[%s1313_s3] sm:$0xff] (!%p292_p9)  ;;  %s1055_s29 = smov (!%p292_p9), [#allocation2]  }
  0x12   : > { %vm336_vm1 = vcmp.ge.s32.totalorder (!%p292_p9), %v335_v7, 1  ;;  %vm337_vm4 = vcmp.lt.s32.totalorder (!%p292_p9), %v335_v7, 127  ;;  %v342_v42 = vld [vmem:[%s1315_s5] sm:$0xff] (!%p292_p9)  ;;  %s988_s14 = sshll.u32 (!%p292_p9), %s1055_s29, 4  ;;  %s989_s14 = int_to_ptr.vmem [resolvable:$false] %s988_s14 }
  0x13   : > { %vm1182_vm3 = vmpackc.low (!%p292_p9), %vm1054_vm2, %vm336_vm1  ;;  %v343_v59 = vld [vmem:[%s1316_s6] sm:$0x1] (!%p292_p9)  ;;  %s990_s16 = scalar_lea.vmem (!%p292_p9), %s989_s14, 512 }
  0x15   : > { %s1329_s21 = smov (!%p328_p10, %s834_s21), 3 }
  0x16   : > { %s835_s22 = sshll.u32 %s1329_s21, 3  ;;  %s833_s21 = sshll.u32 %s324_s17, 4 }
  0x17   : > { %s331_s25 = scalar_lea.vmem %s1310_s0, %s835_s22  ;;  %s326_s22 = scalar_lea.vmem [#allocation2], %s833_s21 }
  0x18   : > { %v1166_v2 = vld [vmem:[%s331_s25] sm:$0xff]  ;;  %v1168_v3 = vld [vmem:[%s331_s25 + $0x8] sm:$0xff]  ;;  %s767_s23 = sshll.u32 %s326_s22, 4  ;;  %s1261_s23 = int_to_ptr.vmem [resolvable:$true] %s767_s23 }
  0x19   : > { %347 = vrot.lane.b32.xlu0 %v1166_v2, %s1051_s26  ;;  %562 = vrot.lane.b32.xlu1 %v1168_v3, %s1051_s26  ;;  %s984_s13 = scalar_lea.vmem %s1261_s23, 256  ;;  %p991_p0 = scmp.lt.s32.totalorder %s1261_s23, %s989_s14 }
  0x1a   : > { %p985_p11 = scmp.ne.s32.totalorder %s1261_s23, %s984_s13  ;;  %p992_p1 = scmp.lt.s32.totalorder %s990_s16, %s984_s13 }
  0x1c   : > { %p986_p12 = pnand %p985_p11, %p1146_p5  ;;  %p993_p2 = por %p992_p1, %p991_p0 }
  0x1d   : > { %352 = vrot.lane.b32.xlu0 %v1166_v2, %s1053_s27  ;;  %565 = vrot.lane.b32.xlu1 %v1168_v3, %s1053_s27 }
  0x1e   : > { %p987_p13 = pneg %p986_p12 }
  0x20   : > { %p994_p3 = pnand %p993_p2, %p987_p13 }
  0x21   : > { %359 = vperm.xlu0 %974, %v339_v5   ;;  %v344_v5 = vld [vmem:[%s1317_s7] sm:$0xff] }
  0x8b   : > { %v348_v8 = vpop.permute.xlu0 %347  ;;  %v563_v11 = vpop.permute.xlu1 %562 }
  0x8c   : > { %v911_v10 = vpack.c.bf16 %v1166_v2, %v348_v8  ;;  %v919_v13 = vpack.c.bf16 %v1168_v3, %v563_v11 }
  0x8e   : > { %913 = vmatpush3.bf16.msk.msra.mxu0 %vm1182_vm3, %v911_v10 }
  0x8f   : > { %878 = vmatprep.subr.mxu0 %v1050_v1  ;;  %v353_v12 = vpop.permute.xlu0 %352  ;;  %v566_v15 = vpop.permute.xlu1 %565 }
  0x92   : > { %879 = vmatpush3.msk.msra.mxu0 %vm337_vm4, %v353_v12 }
  0x93   : > { %881 = vmatmul.mubr.msk.f32.vlgmr.msra.gmra.mrb[0].mxu0 %vm362_vm5, %v338_v14  ;;  %918 = vmatprep.subr.bf16.mxu0 %v1048_v0 }
  0x94   : > { %921 = vmatpush3.bf16.msk.msra.mxu0 %vm1182_vm3, %v919_v13  ;;  %898 = vmatprep.mubr.msk.f32.mxu0 %vm1049_vm0, %v1050_v1 }
  0x95   : > { %896 = vmatprep.subr.mxu0 %v1050_v1 }
  0x98   : > { %897 = vmatpush3.msk.msra.mxu0 %vm337_vm4, %v566_v15  ;;  %v345_v15 = vld [vmem:[%s1318_s8] sm:$0xff] }
  0x99   : > { %899 = vmatmul.mubr.msk.f32.vlgmr.msra.gmra.mrb[2].mxu0 %vm362_vm5, %v338_v14 }
  0xa0   : > { %v360_v16 = vpop.permute.xlu0 %359 }
 0x166   : > { %v432_v17 = vpop.f32.mrb[0].mxu0 }
 0x167   : > { %v433_v18 = vadd.f32 %v432_v17, %v360_v16  ;;  %v882_v19 = vpop.f32.mrb[1].mxu0 }
 0x169   : > { %v436_v20 = vmax.f32 %v433_v18, 0.0 }
 0x16b   : > { %437 = vrot.lane.b32.xlu1 %v436_v20, %s1051_s26 }
 0x16c   : > { %v634_v21 = vpop.f32.mrb[2].mxu0 }
 0x16d   : > { %v635_v22 = vadd.f32 %v634_v21, %v360_v16  ;;  %v900_v23 = vpop.f32.mrb[3].mxu0 }
 0x16f   : > { %v638_v24 = vmax.f32 %v635_v22, 0.0  ;;  %440 = vrot.lane.b32.xlu1 %v436_v20, %s1053_s27 }
 0x171   : > { %639 = vrot.lane.b32.xlu0 %v638_v24, %s1051_s26 }
 0x173   : > { %642 = vrot.lane.b32.xlu1 %v638_v24, %s1053_s27  ;;  %s1266_s27 = scalar_lea.hbm %s1319_s9, %s857_s24 }
 0x175   : > { %445 = vperm.xlu0 %974, %v341_v25  }
 0x1dd   : > { %v438_v26 = vpop.permute.xlu1 %437 }
 0x1de   : > { %v915_v27 = vpack.c.bf16 %v436_v20, %v438_v26 }
 0x1e0   : > { %917 = vmatpush3.bf16.msk.msra.mxu1 %vm1182_vm3, %v915_v27 }
 0x1e1   : > { %887 = vmatprep.subr.mxu1 %v1050_v1  ;;  %v441_v29 = vpop.permute.xlu1 %440 }
 0x1e3   : > { %v640_v30 = vpop.permute.xlu0 %639 }
 0x1e4   : > { %v923_v31 = vpack.c.bf16 %v638_v24, %v640_v30  ;;  %888 = vmatpush3.msk.msra.mxu1 %vm337_vm4, %v441_v29 }
 0x1e5   : > { %890 = vmatmul.mubr.msk.f32.vlgmr.msra.gmra.mrb[0].mxu1 %vm362_vm5, %v340_v28  ;;  %922 = vmatprep.subr.bf16.mxu1 %v1048_v0  ;;  %v643_v32 = vpop.permute.xlu1 %642  ;;  %v539_v0 = vsub.s32 0, %v538_v58 }
 0x1e6   : > { %925 = vmatpush3.bf16.msk.msra.mxu1 %vm1182_vm3, %v923_v31  ;;  %907 = vmatprep.mubr.msk.f32.mxu1 %vm1049_vm0, %v1050_v1 }
 0x1e7   : > { %905 = vmatprep.subr.mxu1 %v1050_v1 }
 0x1ea   : > { %906 = vmatpush3.msk.msra.mxu1 %vm337_vm4, %v643_v32 }
 0x1eb   : > { %908 = vmatmul.mubr.msk.f32.vlgmr.msra.gmra.mrb[2].mxu1 %vm362_vm5, %v340_v28 }
 0x1f4   : > { %v446_v33 = vpop.permute.xlu0 %445 }
 0x2b8   : > { %v517_v34 = vpop.f32.mrb[0].mxu1 }
 0x2b9   : > { %v1227_v35 = vadd.f32 %v517_v34, %v446_v33  ;;  %v891_v36 = vpop.f32.mrb[1].mxu1 }
 0x2bb   : > { %v521_v37 = vmax.f32 %v1227_v35, 0.0 }
 0x2bd   : > { %522 = vadd.xlane.f32.xlu1 %v521_v37 }
 0x2be   : > { %v711_v38 = vpop.f32.mrb[2].mxu1 }
 0x2bf   : > { %v1232_v39 = vadd.f32 %v711_v38, %v446_v33  ;;  %v909_v40 = vpop.f32.mrb[3].mxu1 }
 0x2c1   : > { %v715_v41 = vmax.f32 %v1232_v39, 0.0 }
 0x2c3   : > { %716 = vadd.xlane.f32.xlu0 %v715_v41 }
 0x34a   : > { %v523_v43 = vpop.xlane.xlu1 %522 }
 0x34b   : > { %v525_v44 = vmul.f32 0.0078125, %v523_v43 }
 0x34d   : > { %v526_v45 = vmul.f32 %v525_v44, %v342_v42 }
 0x34f   : > { %v528_v46 = vsel %vm527_vm6, %v526_v45, 0.0 }
 0x350   : > { %v529_v47 = vrot.slane %v528_v46, 4  ;;  %v717_v48 = vpop.xlane.xlu0 %716 }
 0x351   : > { %v718_v49 = vmul.f32 0.0078125, %v717_v48 }
 0x352   : > { %v530_v50 = vadd.f32 %v529_v47, %v528_v46 }
 0x353   : > { %v719_v51 = vmul.f32 %v718_v49, %v342_v42 }
 0x354   : > { %v531_v52 = vrot.slane %v530_v50, 2 }
 0x355   : > { %v720_v53 = vsel %vm527_vm6, %v719_v51, 0.0 }
 0x356   : > { %v532_v54 = vadd.f32 %v531_v52, %v530_v50  ;;  %v721_v55 = vrot.slane %v720_v53, 4 }
 0x358   : > { %v533_v56 = vrot.slane %v532_v54, 1  ;;  %v722_v57 = vadd.f32 %v721_v55, %v720_v53 }
 0x35a   : > { %v723_v60 = vrot.slane %v722_v57, 2  ;;  %v534_v61 = vadd.f32 %v533_v56, %v532_v54 }
 0x35c   : > { %v724_v62 = vadd.f32 %v723_v60, %v722_v57  ;;  %v535_v63 = vadd.f32 %v534_v61, %v343_v59 }
 0x35e   : > { %v725_v1 = vrot.slane %v724_v62, 1  ;;  %v536_v4 = vmax.f32 %v535_v63, 0.0 }
 0x360   : > { %v540_v7 = vrot.slane %v536_v4, %v539_v0  ;;  %v726_v8 = vadd.f32 %v725_v1, %v724_v62 }
 0x362   : > { %v541_v9 = vmul.f32 %v540_v7, %v344_v5  ;;  %v727_v10 = vadd.f32 %v726_v8, %v343_v59 }
 0x364   : > { %v542_v6 = vsel %vm527_vm6, %v541_v9, 0.0  ;;  %v728_v11 = vmax.f32 %v727_v10, 0.0 }
 0x365   : > { %543 = vadd.xlane.f32.xlu0 %v542_v6 }
 0x366   : > { %v732_v12 = vrot.slane %v728_v11, %v539_v0 }
 0x368   : > { %v733_v13 = vmul.f32 %v732_v12, %v344_v5 }
 0x36a   : > { %v734_v14 = vsel %vm527_vm6, %v733_v13, 0.0 }
 0x36b   : > { %735 = vadd.xlane.f32.xlu1 %v734_v14 }
 0x3f2   : > { %v544_v16 = vpop.xlane.xlu0 %543 }
 0x3f3   : > { %v545_v17 = vadd.f32 %v544_v16, %v345_v15 }
 0x3f5   : > { %v842_v18 = vmul.f32 -1.442695, %v545_v17 }
 0x3f7   : > { %976 = vpow2.f32 %v842_v18 }
 0x3f8   : > { %v736_v19 = vpop.xlane.xlu1 %735 }
 0x3f9   : > { %v737_v20 = vadd.f32 %v736_v19, %v345_v15 }
 0x3fb   : > { %v850_v21 = vmul.f32 -1.442695, %v737_v20 }
 0x3fd   : > { %978 = vpow2.f32 %v850_v21 }
 0x401   : > { %v977_v22 = vpop.eup %976 }
 0x402   : > { %v549_v23 = vadd.f32 1.0, %v977_v22 }
 0x404   : > { %980 = vrcp.f32 %v549_v23 }
 0x407   : > { %v979_v24 = vpop.eup %978 }
 0x408   : > { %v741_v25 = vadd.f32 1.0, %v979_v24 }
 0x40a   : > { %982 = vrcp.f32 %v741_v25 }
 0x40e   : > { %v981_v26 = vpop.eup %980 }
 0x40f   : > { %554 = vperm.xlu0 %974, %v981_v26  }
 0x414   : > { %v983_v27 = vpop.eup %982 }
 0x415   : > { %746 = vperm.xlu1 %975, %v983_v27  }
 0x48e   : > { %v555_v28 = vpop.permute.xlu0 %554 }
 0x48f   : > { %v557_v29 = vmul.f32 %v555_v28, %v521_v37 }
 0x491   : > { %v558_v30 = vadd.f32 %v557_v29, %v1166_v2 }
 0x493   : > { %559 = vst [vmem:[%s326_s22] sm:$0xff] %v558_v30 }
 0x494   : > { %v747_v31 = vpop.permute.xlu1 %746 }
 0x495   : > { %v749_v32 = vmul.f32 %v747_v31, %v715_v41 }
 0x497   : > { %v750_v2 = vadd.f32 %v1168_v3, %v749_v32 }
 0x499   : > { %851 = vst [vmem:[%s326_s22 + $0x8] sm:$0xff] %v750_v2 }
 0x49a   : > { %997 = shalt.err (!%p994_p3)
}
 0x49b   : > { %s998_s17 = scalar_lea.hbm %s1266_s27, 256  ;;  %s1002_s24 = scalar_lea.hbm %s1319_s9, 512 }
 0x49c   : > { %p999_p4 = scmp.ne.s32.totalorder %s1266_s27, %s998_s17  ;;  %p1003_p9 = scmp.lt.u32.totalorder %s1266_s27, %s1319_s9 }
 0x49d   : > { %p1004_p10 = scmp.lt.u32.totalorder %s1002_s24, %s998_s17  ;;  %p1006_p12 = scmp.lt.u32.totalorder %s998_s17, %s1266_s27 }
 0x49e   : > { %p1000_p7 = pnand %p999_p4, %p1146_p5 }
 0x49f   : > { %p1005_p11 = por %p1004_p10, %p1003_p9 }
 0x4a0   : > { %p1001_p8 = pneg %p1000_p7 }
 0x4a1   : > { %p1007_p13 = por %p1006_p12, %p1005_p11 }
 0x4a3   : > { %p1008_p0 = pnand %p1007_p13, %p1001_p8 }
 0x4a5   : > { %1011 = shalt.err (!%p1008_p0)
}
 0x4a6   : > { %s1056_s13 = smov 128   ;;  %s1057_s29 = smov 8  }
 0x4a7   : > { %926 = dma.vmem_to_hbm [thread:$0]  (%p1146_p5), %s1261_s23, 256, %s1266_s27, %s1269_s28, %s1056_s13, %s1056_s13, %s1057_s29  }
 0x4a8 PF: > { %p932_p1 = scmp.ge.s32.totalorder %s1046_s12, 2  ;;  %s782_s14 = sand.u32 1, %s1034_s30  }
 0x4a9   : > { %s783_s16 = scalar_lea.sflag [#allocation3], %s782_s14 }
 0x4aa   : > { %p929_p2 = pnand %p932_p1, %p1150_p6 }
 0x4ac   : > { %1029 = dma.done.wait (!%p929_p2), %s783_s16, 256  }
 0x4ad   : > { %1031 = vsyncadd (!%p929_p2), %s783_s16, 4294967040  ;;  %p19_p3 = scmp.ge.s32.totalorder %s1133_s15, 4   ;;  %s1324_s30 = smov %s1038_s10 }
 0x4ae   : > { %s1325_s10 = smov %s1042_s11  ;;  %s1326_s11 = smov %s1144_s18 }
 0x4af   : > { %s1327_s12 = smov %s1133_s15  ;;  %21 = sbr.rel (!%p19_p3) target bundleno = 3 (0x3), region = 93 }
 0x4b6   :  { %788 = vsyncpa [#allocation3], 1 }
 0x4b7   :  { %790 = vsyncpa [#allocation3 + $0x1], 1 }

</bundles_post_ra>
